<compile_context>
chip_gen: v5e
topology: v5e:2x2
jax: 0.10.0
libtpu: 0.0.40
codegen_flags: <defaults>
</compile_context>

<pallas_src>
import functools

import jax
import jax.numpy as jnp
from jax import lax
from jax.experimental import pallas as pl
from jax.experimental.pallas import tpu as pltpu


_VMEM_TARGET = 40 * 1024 * 1024   # sized for v7x (64 MiB VMEM per TensorCore)
_LN_EPS = 1e-5


# --------------------------------------------------------------------------
# kernels
# --------------------------------------------------------------------------
def _kv_kernel(xp_ref, srw_ref, srb_ref, g_ref, beta_ref, kw_ref, vw_ref,
               k_ref, v_ref):
    """Per-batch kv path: seq-reduction conv (as matmul) + LayerNorm + k/v proj."""
    xr = jnp.dot(xp_ref[0], srw_ref[...],
                 preferred_element_type=jnp.float32) + srb_ref[...]     # (Nr, C)
    # two-pass LayerNorm over the channel dim (f32)
    mu = jnp.mean(xr, axis=-1, keepdims=True)
    xc = xr - mu
    var = jnp.mean(xc * xc, axis=-1, keepdims=True)
    xn = xc * lax.rsqrt(var + _LN_EPS) * g_ref[...] + beta_ref[...]
    xn16 = xn.astype(jnp.bfloat16)
    # k / v projections written straight to their outputs (kv_w pre-split)
    k_ref[0] = jnp.dot(xn16, kw_ref[...],
                       preferred_element_type=jnp.float32).astype(k_ref.dtype)
    v_ref[0] = jnp.dot(xn16, vw_ref[...],
                       preferred_element_type=jnp.float32).astype(v_ref.dtype)


def _attn_kernel(x_ref, k_ref, v_ref, qw_ref, pw_ref, pb_ref, o_ref, attn_s,
                 *, num_heads, head_dim):
    """Per (batch, N-tile): q proj + per-head attention + output projection."""
    # q projection (softmax scale pre-folded into qw in prepare_params)
    q = jnp.dot(x_ref[0], qw_ref[...],
                preferred_element_type=jnp.float32).astype(jnp.bfloat16)  # (tn, C)
    k = k_ref[0]                                                          # (Nr, C)
    v = v_ref[0]                                                          # (Nr, C)

    for h in range(num_heads):
        lo, hi = h * head_dim, (h + 1) * head_dim
        s = lax.dot_general(q[:, lo:hi], k[:, lo:hi],
                            dimension_numbers=(((1,), (1,)), ((), ())),
                            preferred_element_type=jnp.float32)           # (tn, Nr)
        m = jnp.max(s, axis=-1, keepdims=True)
        p = jnp.exp(s - m)                                                # unnormalized
        denom = jnp.sum(p, axis=-1, keepdims=True)
        o_h = jnp.dot(p.astype(jnp.bfloat16), v[:, lo:hi],
                      preferred_element_type=jnp.float32)                 # (tn, dh)
        # deferred softmax normalization: scale the (tn, dh) head output
        # instead of the (tn, Nr) score matrix (EUP reciprocal, fewer VPU muls)
        o_h = o_h * pl.reciprocal(denom, approx=True)
        attn_s[:, lo:hi] = o_h.astype(jnp.bfloat16)

    y = jnp.dot(attn_s[...], pw_ref[...],
                preferred_element_type=jnp.float32) + pb_ref[...]
    # TODO(synk): for PVT stages with C < 128, a wrapper-side lane-dense output
    # slab (last dim a multiple of 128) would avoid half-masked stores here.
    o_ref[0] = y.astype(o_ref.dtype)


# --------------------------------------------------------------------------
# host-side helpers
# --------------------------------------------------------------------------
def _extract_patches(x, H, W, sr):
    """(B, N, C) tokens -> (B, Nr, C*sr*sr) patches, flattened (ci, kh, kw)."""
    # TODO(synk): fold this relayout into the kv kernel (strided in-kernel
    # loads) to remove one extra B*N*C activation write+read from HBM.
    B, N, C = x.shape
    Hr, Wr = H // sr, W // sr
    img = x.reshape(B, Hr, sr, Wr, sr, C)               # (B, hr, kh, wr, kw, C)
    patches = jnp.transpose(img, (0, 1, 3, 5, 2, 4))    # (B, hr, wr, C, kh, kw)
    return patches.reshape(B, Hr * Wr, C * sr * sr)


def prepare_params(params, *, num_heads, qk_scale=None):
    """One-time weight prep: reshape/transpose the conv weight, fold the
    attention scale into q_w, split kv_w, cast matmul operands to bf16
    (elementwise params stay f32)."""
    q_w = jnp.asarray(params["q_w"])
    C = q_w.shape[0]
    sr_w = jnp.asarray(params["sr_w"])                  # (C, C, sr, sr) OIHW
    sr = int(sr_w.shape[-1])
    K = C * sr * sr
    head_dim = C // num_heads
    scale = qk_scale if qk_scale is not None else head_dim ** -0.5
    kv_w = jnp.asarray(params["kv_w"])                  # (C, 2C)
    return {
        "C": C, "sr": sr,
        "sr_w": sr_w.reshape(C, K).T.astype(jnp.bfloat16),             # (K, C)
        "sr_b": jnp.asarray(params["sr_b"]).reshape(1, C).astype(jnp.float32),
        "ln_g": jnp.asarray(params["ln_g"]).reshape(1, C).astype(jnp.float32),
        "ln_b": jnp.asarray(params["ln_b"]).reshape(1, C).astype(jnp.float32),
        "q_w": (q_w * scale).astype(jnp.bfloat16),                      # scale folded
        "k_w": kv_w[:, :C].astype(jnp.bfloat16),
        "v_w": kv_w[:, C:].astype(jnp.bfloat16),
        "proj_w": jnp.asarray(params["proj_w"]).astype(jnp.bfloat16),
        "proj_b": jnp.asarray(params["proj_b"]).reshape(1, C).astype(jnp.float32),
    }


def _const_spec(shape, index_map, single_buffer):
    """BlockSpec for an operand whose block never changes across the grid.

    pl.Buffered(1) disables double buffering for it (the block is fetched once
    and reused), freeing VMEM for larger sequence tiles."""
    if single_buffer:
        try:
            return pl.BlockSpec(shape, index_map, pipeline_mode=pl.Buffered(1))
        except (AttributeError, TypeError):
            pass
    return pl.BlockSpec(shape, index_map)


def _attn_vmem_bytes(tn, C, Nr, out_bytes):
    x_blk = 2 * tn * C * 2                       # query tile, double-buffered bf16
    kv_blk = 2 * 2 * Nr * C * 2                  # k and v tiles, double-buffered bf16
    out_blk = 2 * tn * C * out_bytes             # output tile, double-buffered
    weights = 2 * C * C * 2 + C * 4              # q_w, proj_w (single-buffered) + proj_b
    scratch = tn * C * 2                         # per-head output collector
    temps = 2 * tn * Nr * 4 + 2 * tn * C * 4     # scores/probs + q (f32 live values)
    return int(1.5 * (x_blk + kv_blk + out_blk + weights + scratch + temps))


def _kv_vmem_bytes(Nr, K, C):
    blk = 2 * Nr * K * 2 + 2 * 2 * Nr * C * 2
    weights = K * C * 2 + 2 * C * C * 2 + 3 * C * 4
    temps = 6 * Nr * C * 4
    return int(1.5 * (blk + weights + temps))


def _pick_tn(N, C, Nr, out_bytes):
    """Largest N-tile (preferably the whole sequence -> grid=(B,1)) whose VMEM
    footprint fits the v7x-safe budget; tn must divide N and be a multiple of
    16 (bf16 sublane packing) unless it is the whole sequence."""
    cands = sorted({d for d in range(16, N, 16) if N % d == 0} | {N}, reverse=True)
    for t in cands:
        if _attn_vmem_bytes(t, C, Nr, out_bytes) <= _VMEM_TARGET:
            return t
    return cands[-1]


# --------------------------------------------------------------------------
# forward pass
# --------------------------------------------------------------------------
def sequence_reduction_attention(x, prepped, *, H, W, sr_ratio, num_heads,
                                 attn_mode="self", tn=None, out_dtype=None):
    """Forward pass of SequenceReductionAttention (eval mode, sr_ratio > 1)."""
    B, N, C = x.shape
    assert C % num_heads == 0 and C == prepped["C"] and sr_ratio == prepped["sr"]
    # TODO(synk): the sr_ratio == 1 branch of the PyTorch module references a
    # missing `self.kv` attribute; only sr_ratio > 1 is implemented.
    assert sr_ratio > 1 and N == H * W
    assert H % sr_ratio == 0 and W % sr_ratio == 0
    head_dim = C // num_heads
    Nr = (H // sr_ratio) * (W // sr_ratio)
    K = C * sr_ratio * sr_ratio
    out_dtype = x.dtype if out_dtype is None else out_dtype
    out_bytes = jnp.dtype(out_dtype).itemsize

    if tn is None:
        tn = _pick_tn(N, C, Nr, out_bytes)
    assert N % tn == 0 and (tn == N or tn % 16 == 0)
    n_tiles = N // tn

    x_bf = x.astype(jnp.bfloat16)
    xp = _extract_patches(x_bf, H, W, sr_ratio)          # (B, Nr, K) bf16

    if attn_mode == "self":
        kv_batch = lambda b: b
    elif attn_mode == "cross":
        assert B % 2 == 0, "cross attention needs an even batch"
        half = B // 2
        kv_batch = lambda b: (b + half) % B              # swap batch halves
    else:
        raise ValueError(f"unknown attn_mode: {attn_mode}")

    def run(single_buffer):
        # ---- stage 1: per-batch kv path (conv + LayerNorm + k/v projection)
        kv_const = lambda shp: _const_spec(shp, lambda b: (0, 0), single_buffer)
        k, v = pl.pallas_call(
            _kv_kernel,
            out_shape=(jax.ShapeDtypeStruct((B, Nr, C), jnp.bfloat16),
                       jax.ShapeDtypeStruct((B, Nr, C), jnp.bfloat16)),
            grid_spec=pltpu.PrefetchScalarGridSpec(
                num_scalar_prefetch=0,
                grid=(B,),
                in_specs=[
                    pl.BlockSpec((1, Nr, K), lambda b: (b, 0, 0)),   # patches
                    kv_const((K, C)),                                # sr conv weight
                    kv_const((1, C)),                                # sr conv bias
                    kv_const((1, C)),                                # layernorm gamma
                    kv_const((1, C)),                                # layernorm beta
                    kv_const((C, C)),                                # k weight
                    kv_const((C, C)),                                # v weight
                ],
                out_specs=(pl.BlockSpec((1, Nr, C), lambda b: (b, 0, 0)),
                           pl.BlockSpec((1, Nr, C), lambda b: (b, 0, 0))),
            ),
            compiler_params=pltpu.CompilerParams(
                dimension_semantics=("parallel",),
                vmem_limit_bytes=max(_kv_vmem_bytes(Nr, K, C), 16 * 1024 * 1024)),
        )(xp, prepped["sr_w"], prepped["sr_b"], prepped["ln_g"], prepped["ln_b"],
          prepped["k_w"], prepped["v_w"])

        # ---- stage 2: attention + output projection, fully parallel grid
        at_const = lambda shp: _const_spec(shp, lambda b, n: (0, 0), single_buffer)
        kernel = functools.partial(_attn_kernel, num_heads=num_heads,
                                   head_dim=head_dim)
        return pl.pallas_call(
            kernel,
            out_shape=jax.ShapeDtypeStruct((B, N, C), out_dtype),
            grid_spec=pltpu.PrefetchScalarGridSpec(
                num_scalar_prefetch=0,
                grid=(B, n_tiles),
                in_specs=[
                    pl.BlockSpec((1, tn, C), lambda b, n: (b, n, 0)),            # x
                    pl.BlockSpec((1, Nr, C), lambda b, n: (kv_batch(b), 0, 0)),  # k
                    pl.BlockSpec((1, Nr, C), lambda b, n: (kv_batch(b), 0, 0)),  # v
                    at_const((C, C)),                                            # q_w
                    at_const((C, C)),                                            # proj_w
                    at_const((1, C)),                                            # proj_b
                ],
                out_specs=pl.BlockSpec((1, tn, C), lambda b, n: (b, n, 0)),
                scratch_shapes=[pltpu.VMEM((tn, C), jnp.bfloat16)],
            ),
            compiler_params=pltpu.CompilerParams(
                dimension_semantics=("parallel", "parallel"),
                vmem_limit_bytes=max(_attn_vmem_bytes(tn, C, Nr, out_bytes),
                                     16 * 1024 * 1024)),
        )(x_bf, k, v, prepped["q_w"], prepped["proj_w"], prepped["proj_b"])

    try:
        return run(single_buffer=True)
    except Exception:
        # pl.Buffered(1) not supported by this JAX/Mosaic build -> fall back to
        # default double-buffered specs (costs VMEM headroom, not correctness).
        return run(single_buffer=False)


# --------------------------------------------------------------------------
# pure-JAX f32 reference (mirrors the PyTorch forward, eval mode)
# --------------------------------------------------------------------------
def reference(x, params, *, H, W, sr_ratio, num_heads, attn_mode="self"):
    B, N, C = x.shape
    dh = C // num_heads
    scale = dh ** -0.5
    Hr, Wr = H // sr_ratio, W // sr_ratio
    Nr = Hr * Wr

    img = jnp.transpose(x, (0, 2, 1)).reshape(B, C, H, W)
    xr = lax.conv_general_dilated(
        img, params["sr_w"], (sr_ratio, sr_ratio), "VALID",
        dimension_numbers=("NCHW", "OIHW", "NCHW"))
    xr = xr + params["sr_b"][None, :, None, None]
    xr = xr.reshape(B, C, Nr).transpose(0, 2, 1)          # (B, Nr, C)
    mean = xr.mean(-1, keepdims=True)
    var = ((xr - mean) ** 2).mean(-1, keepdims=True)
    xr = (xr - mean) / jnp.sqrt(var + 1e-5) * params["ln_g"] + params["ln_b"]

    q = x @ params["q_w"]
    kv = xr @ params["kv_w"]
    k, v = kv[..., :C], kv[..., C:]
    if attn_mode == "cross":
        half = B // 2
        k = jnp.concatenate([k[half:], k[:half]], axis=0)
        v = jnp.concatenate([v[half:], v[:half]], axis=0)

    qh = q.reshape(B, N, num_heads, dh).transpose(0, 2, 1, 3)
    kh = k.reshape(B, Nr, num_heads, dh).transpose(0, 2, 1, 3)
    vh = v.reshape(B, Nr, num_heads, dh).transpose(0, 2, 1, 3)
    s = jnp.einsum("bhnd,bhmd->bhnm", qh, kh) * scale
    p = jax.nn.softmax(s, axis=-1)
    o = jnp.einsum("bhnm,bhmd->bhnd", p, vh)
    o = o.transpose(0, 2, 1, 3).reshape(B, N, C)
    return o @ params["proj_w"] + params["proj_b"]


if __name__ == "__main__":
    B, H, W, C = 2, 8, 8, 32
    N = H * W
    num_heads = 4
    sr_ratio = 2

    key = jax.random.PRNGKey(0)
    ks = jax.random.split(key, 9)
    params = {
        "sr_w": 0.1 * jax.random.normal(ks[0], (C, C, sr_ratio, sr_ratio), jnp.float32),
        "sr_b": 0.1 * jax.random.normal(ks[1], (C,), jnp.float32),
        "ln_g": 1.0 + 0.05 * jax.random.normal(ks[2], (C,), jnp.float32),
        "ln_b": 0.05 * jax.random.normal(ks[3], (C,), jnp.float32),
        "q_w": 0.1 * jax.random.normal(ks[4], (C, C), jnp.float32),     # qkv_bias=False
        "kv_w": 0.1 * jax.random.normal(ks[5], (C, 2 * C), jnp.float32),
        "proj_w": 0.1 * jax.random.normal(ks[6], (C, C), jnp.float32),
        "proj_b": 0.1 * jax.random.normal(ks[7], (C,), jnp.float32),
    }
    x = jax.random.normal(ks[8], (B, N, C), jnp.float32)

    prepped = prepare_params(params, num_heads=num_heads)   # one-time weight prep

    ok = True
    cases = [
        ("self", None, jnp.bfloat16),   # auto tn (= whole sequence), bf16 output
        ("cross", 32, jnp.float32),     # explicit N-tiling, f32 output
    ]
    for mode, tn, out_dtype in cases:
        out = sequence_reduction_attention(
            x, prepped, H=H, W=W, sr_ratio=sr_ratio, num_heads=num_heads,
            attn_mode=mode, tn=tn, out_dtype=out_dtype)
        out = jax.block_until_ready(out).astype(jnp.float32)
        ref = reference(x, params, H=H, W=W, sr_ratio=sr_ratio,
                        num_heads=num_heads, attn_mode=mode)
        if not jnp.allclose(out, ref, atol=3e-2, rtol=3e-2):
            ok = False
            print(f"mode={mode} FAILED, max abs err:",
                  float(jnp.max(jnp.abs(out - ref))))

    if ok:
        print("KERNEL_OK")
</pallas_src>

<mosaic_0001>
module attributes {stable_mosaic.version = 11 : i64} {
  func.func @_kv_kernel(%arg0: i32, %arg1: memref<1x16x128xbf16, #tpu.memory_space<vmem>>, %arg2: memref<128x32xbf16, #tpu.memory_space<vmem>>, %arg3: memref<1x32xf32, #tpu.memory_space<vmem>>, %arg4: memref<1x32xf32, #tpu.memory_space<vmem>>, %arg5: memref<1x32xf32, #tpu.memory_space<vmem>>, %arg6: memref<32x32xbf16, #tpu.memory_space<vmem>>, %arg7: memref<32x32xbf16, #tpu.memory_space<vmem>>, %arg8: memref<1x16x32xbf16, #tpu.memory_space<vmem>>, %arg9: memref<1x16x32xbf16, #tpu.memory_space<vmem>>) attributes {dimension_semantics = [#tpu.dimension_semantics<parallel>], iteration_bounds = array<i64: 2>, scalar_prefetch = 0 : i64, scratch_operands = 0 : i64, tpu.core_type = #tpu.core_type<tc>, window_params = [{transform_indices = @transform_0, window_bounds = array<i64: 1, 16, 128>}, {pipeline_mode = #tpu.pipeline_mode<synchronous>, transform_indices = @transform_1, window_bounds = array<i64: 128, 32>}, {pipeline_mode = #tpu.pipeline_mode<synchronous>, transform_indices = @transform_2, window_bounds = array<i64: 1, 32>}, {pipeline_mode = #tpu.pipeline_mode<synchronous>, transform_indices = @transform_3, window_bounds = array<i64: 1, 32>}, {pipeline_mode = #tpu.pipeline_mode<synchronous>, transform_indices = @transform_4, window_bounds = array<i64: 1, 32>}, {pipeline_mode = #tpu.pipeline_mode<synchronous>, transform_indices = @transform_5, window_bounds = array<i64: 32, 32>}, {pipeline_mode = #tpu.pipeline_mode<synchronous>, transform_indices = @transform_6, window_bounds = array<i64: 32, 32>}, {transform_indices = @transform_7, window_bounds = array<i64: 1, 16, 32>}, {transform_indices = @transform_8, window_bounds = array<i64: 1, 16, 32>}]} {
    %c0 = arith.constant 0 : index
    %c0_0 = arith.constant 0 : index
    %c0_1 = arith.constant 0 : index
    %0 = vector.load %arg1[%c0, %c0_0, %c0_1] : memref<1x16x128xbf16, #tpu.memory_space<vmem>>, vector<1x16x128xbf16>
    %1 = vector.shape_cast %0 : vector<1x16x128xbf16> to vector<16x128xbf16>
    %c0_2 = arith.constant 0 : index
    %c0_3 = arith.constant 0 : index
    %2 = vector.load %arg2[%c0_2, %c0_3] : memref<128x32xbf16, #tpu.memory_space<vmem>>, vector<128x32xbf16>
    %cst = arith.constant dense<0.000000e+00> : vector<16x32xf32>
    %3 = tpu.matmul %1, %2, %cst {dimension_numbers = #tpu.dot_dimension_numbers<[1], [0], [0], [1], [0, 0, 1, 1], [], []>} : vector<16x128xbf16>, vector<128x32xbf16>, vector<16x32xf32> -> vector<16x32xf32>
    %c0_4 = arith.constant 0 : index
    %c0_5 = arith.constant 0 : index
    %4 = vector.load %arg3[%c0_4, %c0_5] : memref<1x32xf32, #tpu.memory_space<vmem>>, vector<1x32xf32>
    %5 = vector.broadcast %4 : vector<1x32xf32> to vector<16x32xf32>
    %6 = arith.addf %3, %5 : vector<16x32xf32>
    %cst_6 = arith.constant dense<0.000000e+00> : vector<16xf32>
    %7 = vector.multi_reduction <add>, %6, %cst_6 [1] : vector<16x32xf32> to vector<16xf32>
    %8 = vector.shape_cast %7 : vector<16xf32> to vector<16x1xf32>
    %cst_7 = arith.constant 3.200000e+01 : f32
    %9 = vector.broadcast %cst_7 : f32 to vector<16x1xf32>
    %10 = arith.divf %8, %9 : vector<16x1xf32>
    %11 = vector.broadcast %10 : vector<16x1xf32> to vector<16x32xf32>
    %12 = arith.subf %6, %11 : vector<16x32xf32>
    %13 = arith.mulf %12, %12 : vector<16x32xf32>
    %cst_8 = arith.constant dense<0.000000e+00> : vector<16xf32>
    %14 = vector.multi_reduction <add>, %13, %cst_8 [1] : vector<16x32xf32> to vector<16xf32>
    %15 = vector.shape_cast %14 : vector<16xf32> to vector<16x1xf32>
    %cst_9 = arith.constant 3.200000e+01 : f32
    %16 = vector.broadcast %cst_9 : f32 to vector<16x1xf32>
    %17 = arith.divf %15, %16 : vector<16x1xf32>
    %cst_10 = arith.constant 9.99999974E-6 : f32
    %18 = vector.broadcast %cst_10 : f32 to vector<16x1xf32>
    %19 = arith.addf %17, %18 : vector<16x1xf32>
    %20 = math.rsqrt %19 : vector<16x1xf32>
    %21 = vector.broadcast %20 : vector<16x1xf32> to vector<16x32xf32>
    %22 = arith.mulf %12, %21 : vector<16x32xf32>
    %c0_11 = arith.constant 0 : index
    %c0_12 = arith.constant 0 : index
    %23 = vector.load %arg4[%c0_11, %c0_12] : memref<1x32xf32, #tpu.memory_space<vmem>>, vector<1x32xf32>
    %24 = vector.broadcast %23 : vector<1x32xf32> to vector<16x32xf32>
    %25 = arith.mulf %22, %24 : vector<16x32xf32>
    %c0_13 = arith.constant 0 : index
    %c0_14 = arith.constant 0 : index
    %26 = vector.load %arg5[%c0_13, %c0_14] : memref<1x32xf32, #tpu.memory_space<vmem>>, vector<1x32xf32>
    %27 = vector.broadcast %26 : vector<1x32xf32> to vector<16x32xf32>
    %28 = arith.addf %25, %27 : vector<16x32xf32>
    %29 = arith.truncf %28 : vector<16x32xf32> to vector<16x32xbf16>
    %c0_15 = arith.constant 0 : index
    %c0_16 = arith.constant 0 : index
    %30 = vector.load %arg6[%c0_15, %c0_16] : memref<32x32xbf16, #tpu.memory_space<vmem>>, vector<32x32xbf16>
    %cst_17 = arith.constant dense<0.000000e+00> : vector<16x32xf32>
    %31 = tpu.matmul %29, %30, %cst_17 {dimension_numbers = #tpu.dot_dimension_numbers<[1], [0], [0], [1], [0, 0, 1, 1], [], []>} : vector<16x32xbf16>, vector<32x32xbf16>, vector<16x32xf32> -> vector<16x32xf32>
    %32 = arith.truncf %31 : vector<16x32xf32> to vector<16x32xbf16>
    %c0_18 = arith.constant 0 : index
    %c0_19 = arith.constant 0 : index
    %c0_20 = arith.constant 0 : index
    %33 = vector.load %arg8[%c0_18, %c0_19, %c0_20] : memref<1x16x32xbf16, #tpu.memory_space<vmem>>, vector<1x16x32xbf16>
    %34 = vector.shape_cast %33 : vector<1x16x32xbf16> to vector<16x32xbf16>
    %35 = vector.shape_cast %32 : vector<16x32xbf16> to vector<1x16x32xbf16>
    tpu.vector_store %arg8[%c0_18, %c0_19, %c0_20], %35 {strides = array<i32>} : memref<1x16x32xbf16, #tpu.memory_space<vmem>>, vector<1x16x32xbf16>,
    %c0_21 = arith.constant 0 : index
    %c0_22 = arith.constant 0 : index
    %36 = vector.load %arg7[%c0_21, %c0_22] : memref<32x32xbf16, #tpu.memory_space<vmem>>, vector<32x32xbf16>
    %cst_23 = arith.constant dense<0.000000e+00> : vector<16x32xf32>
    %37 = tpu.matmul %29, %36, %cst_23 {dimension_numbers = #tpu.dot_dimension_numbers<[1], [0], [0], [1], [0, 0, 1, 1], [], []>} : vector<16x32xbf16>, vector<32x32xbf16>, vector<16x32xf32> -> vector<16x32xf32>
    %38 = arith.truncf %37 : vector<16x32xf32> to vector<16x32xbf16>
    %c0_24 = arith.constant 0 : index
    %c0_25 = arith.constant 0 : index
    %c0_26 = arith.constant 0 : index
    %39 = vector.load %arg9[%c0_24, %c0_25, %c0_26] : memref<1x16x32xbf16, #tpu.memory_space<vmem>>, vector<1x16x32xbf16>
    %40 = vector.shape_cast %39 : vector<1x16x32xbf16> to vector<16x32xbf16>
    %41 = vector.shape_cast %38 : vector<16x32xbf16> to vector<1x16x32xbf16>
    tpu.vector_store %arg9[%c0_24, %c0_25, %c0_26], %41 {strides = array<i32>} : memref<1x16x32xbf16, #tpu.memory_space<vmem>>, vector<1x16x32xbf16>,
    return
  }
  func.func @transform_0(%arg0: i32) -> (i32, i32, i32) {
    %c0_i32 = arith.constant 0 : i32
    %c0_i32_0 = arith.constant 0 : i32
    %c0_i32_1 = arith.constant 0 : i32
    return %arg0, %c0_i32, %c0_i32_0 : i32, i32, i32
  }
  func.func @transform_1(%arg0: i32) -> (i32, i32) {
    %c0_i32 = arith.constant 0 : i32
    %c0_i32_0 = arith.constant 0 : i32
    %c0_i32_1 = arith.constant 0 : i32
    return %c0_i32, %c0_i32_0 : i32, i32
  }
  func.func @transform_2(%arg0: i32) -> (i32, i32) {
    %c0_i32 = arith.constant 0 : i32
    %c0_i32_0 = arith.constant 0 : i32
    %c0_i32_1 = arith.constant 0 : i32
    return %c0_i32, %c0_i32_0 : i32, i32
  }
  func.func @transform_3(%arg0: i32) -> (i32, i32) {
    %c0_i32 = arith.constant 0 : i32
    %c0_i32_0 = arith.constant 0 : i32
    %c0_i32_1 = arith.constant 0 : i32
    return %c0_i32, %c0_i32_0 : i32, i32
  }
  func.func @transform_4(%arg0: i32) -> (i32, i32) {
    %c0_i32 = arith.constant 0 : i32
    %c0_i32_0 = arith.constant 0 : i32
    %c0_i32_1 = arith.constant 0 : i32
    return %c0_i32, %c0_i32_0 : i32, i32
  }
  func.func @transform_5(%arg0: i32) -> (i32, i32) {
    %c0_i32 = arith.constant 0 : i32
    %c0_i32_0 = arith.constant 0 : i32
    %c0_i32_1 = arith.constant 0 : i32
    return %c0_i32, %c0_i32_0 : i32, i32
  }
  func.func @transform_6(%arg0: i32) -> (i32, i32) {
    %c0_i32 = arith.constant 0 : i32
    %c0_i32_0 = arith.constant 0 : i32
    %c0_i32_1 = arith.constant 0 : i32
    return %c0_i32, %c0_i32_0 : i32, i32
  }
  func.func @transform_7(%arg0: i32) -> (i32, i32, i32) {
    %c0_i32 = arith.constant 0 : i32
    %c0_i32_0 = arith.constant 0 : i32
    %c0_i32_1 = arith.constant 0 : i32
    return %arg0, %c0_i32, %c0_i32_0 : i32, i32, i32
  }
  func.func @transform_8(%arg0: i32) -> (i32, i32, i32) {
    %c0_i32 = arith.constant 0 : i32
    %c0_i32_0 = arith.constant 0 : i32
    %c0_i32_1 = arith.constant 0 : i32
    return %arg0, %c0_i32, %c0_i32_0 : i32, i32, i32
  }
}

module attributes {stable_mosaic.version = 11 : i64} {
  func.func @_kv_kernel(%arg0: i32, %arg1: memref<1x16x128xbf16, #tpu.memory_space<vmem>>, %arg2: memref<128x32xbf16, #tpu.memory_space<vmem>>, %arg3: memref<1x32xf32, #tpu.memory_space<vmem>>, %arg4: memref<1x32xf32, #tpu.memory_space<vmem>>, %arg5: memref<1x32xf32, #tpu.memory_space<vmem>>, %arg6: memref<32x32xbf16, #tpu.memory_space<vmem>>, %arg7: memref<32x32xbf16, #tpu.memory_space<vmem>>, %arg8: memref<1x16x32xbf16, #tpu.memory_space<vmem>>, %arg9: memref<1x16x32xbf16, #tpu.memory_space<vmem>>) attributes {dimension_semantics = [#tpu.dimension_semantics<parallel>], iteration_bounds = array<i64: 2>, scalar_prefetch = 0 : i64, scratch_operands = 0 : i64, tpu.core_type = #tpu.core_type<tc>, window_params = [{transform_indices = @transform_0, window_bounds = array<i64: 1, 16, 128>}, {pipeline_mode = #tpu.pipeline_mode<synchronous>, transform_indices = @transform_1, window_bounds = array<i64: 128, 32>}, {pipeline_mode = #tpu.pipeline_mode<synchronous>, transform_indices = @transform_2, window_bounds = array<i64: 1, 32>}, {pipeline_mode = #tpu.pipeline_mode<synchronous>, transform_indices = @transform_3, window_bounds = array<i64: 1, 32>}, {pipeline_mode = #tpu.pipeline_mode<synchronous>, transform_indices = @transform_4, window_bounds = array<i64: 1, 32>}, {pipeline_mode = #tpu.pipeline_mode<synchronous>, transform_indices = @transform_5, window_bounds = array<i64: 32, 32>}, {pipeline_mode = #tpu.pipeline_mode<synchronous>, transform_indices = @transform_6, window_bounds = array<i64: 32, 32>}, {transform_indices = @transform_7, window_bounds = array<i64: 1, 16, 32>}, {transform_indices = @transform_8, window_bounds = array<i64: 1, 16, 32>}]} {
    %c0 = arith.constant 0 : index
    %c0_0 = arith.constant 0 : index
    %c0_1 = arith.constant 0 : index
    %0 = vector.load %arg1[%c0, %c0_0, %c0_1] : memref<1x16x128xbf16, #tpu.memory_space<vmem>>, vector<1x16x128xbf16>
    %1 = vector.shape_cast %0 : vector<1x16x128xbf16> to vector<16x128xbf16>
    %c0_2 = arith.constant 0 : index
    %c0_3 = arith.constant 0 : index
    %2 = vector.load %arg2[%c0_2, %c0_3] : memref<128x32xbf16, #tpu.memory_space<vmem>>, vector<128x32xbf16>
    %cst = arith.constant dense<0.000000e+00> : vector<16x32xf32>
    %3 = tpu.matmul %1, %2, %cst {dimension_numbers = #tpu.dot_dimension_numbers<[1], [0], [0], [1], [0, 0, 1, 1], [], []>} : vector<16x128xbf16>, vector<128x32xbf16>, vector<16x32xf32> -> vector<16x32xf32>
    %c0_4 = arith.constant 0 : index
    %c0_5 = arith.constant 0 : index
    %4 = vector.load %arg3[%c0_4, %c0_5] : memref<1x32xf32, #tpu.memory_space<vmem>>, vector<1x32xf32>
    %5 = vector.broadcast %4 : vector<1x32xf32> to vector<16x32xf32>
    %6 = arith.addf %3, %5 : vector<16x32xf32>
    %cst_6 = arith.constant dense<0.000000e+00> : vector<16xf32>
    %7 = vector.multi_reduction <add>, %6, %cst_6 [1] : vector<16x32xf32> to vector<16xf32>
    %8 = vector.shape_cast %7 : vector<16xf32> to vector<16x1xf32>
    %cst_7 = arith.constant 3.200000e+01 : f32
    %9 = vector.broadcast %cst_7 : f32 to vector<16x1xf32>
    %10 = arith.divf %8, %9 : vector<16x1xf32>
    %11 = vector.broadcast %10 : vector<16x1xf32> to vector<16x32xf32>
    %12 = arith.subf %6, %11 : vector<16x32xf32>
    %13 = arith.mulf %12, %12 : vector<16x32xf32>
    %cst_8 = arith.constant dense<0.000000e+00> : vector<16xf32>
    %14 = vector.multi_reduction <add>, %13, %cst_8 [1] : vector<16x32xf32> to vector<16xf32>
    %15 = vector.shape_cast %14 : vector<16xf32> to vector<16x1xf32>
    %cst_9 = arith.constant 3.200000e+01 : f32
    %16 = vector.broadcast %cst_9 : f32 to vector<16x1xf32>
    %17 = arith.divf %15, %16 : vector<16x1xf32>
    %cst_10 = arith.constant 9.99999974E-6 : f32
    %18 = vector.broadcast %cst_10 : f32 to vector<16x1xf32>
    %19 = arith.addf %17, %18 : vector<16x1xf32>
    %20 = math.rsqrt %19 : vector<16x1xf32>
    %21 = vector.broadcast %20 : vector<16x1xf32> to vector<16x32xf32>
    %22 = arith.mulf %12, %21 : vector<16x32xf32>
    %c0_11 = arith.constant 0 : index
    %c0_12 = arith.constant 0 : index
    %23 = vector.load %arg4[%c0_11, %c0_12] : memref<1x32xf32, #tpu.memory_space<vmem>>, vector<1x32xf32>
    %24 = vector.broadcast %23 : vector<1x32xf32> to vector<16x32xf32>
    %25 = arith.mulf %22, %24 : vector<16x32xf32>
    %c0_13 = arith.constant 0 : index
    %c0_14 = arith.constant 0 : index
    %26 = vector.load %arg5[%c0_13, %c0_14] : memref<1x32xf32, #tpu.memory_space<vmem>>, vector<1x32xf32>
    %27 = vector.broadcast %26 : vector<1x32xf32> to vector<16x32xf32>
    %28 = arith.addf %25, %27 : vector<16x32xf32>
    %29 = arith.truncf %28 : vector<16x32xf32> to vector<16x32xbf16>
    %c0_15 = arith.constant 0 : index
    %c0_16 = arith.constant 0 : index
    %30 = vector.load %arg6[%c0_15, %c0_16] : memref<32x32xbf16, #tpu.memory_space<vmem>>, vector<32x32xbf16>
    %cst_17 = arith.constant dense<0.000000e+00> : vector<16x32xf32>
    %31 = tpu.matmul %29, %30, %cst_17 {dimension_numbers = #tpu.dot_dimension_numbers<[1], [0], [0], [1], [0, 0, 1, 1], [], []>} : vector<16x32xbf16>, vector<32x32xbf16>, vector<16x32xf32> -> vector<16x32xf32>
    %32 = arith.truncf %31 : vector<16x32xf32> to vector<16x32xbf16>
    %c0_18 = arith.constant 0 : index
    %c0_19 = arith.constant 0 : index
    %c0_20 = arith.constant 0 : index
    %33 = vector.load %arg8[%c0_18, %c0_19, %c0_20] : memref<1x16x32xbf16, #tpu.memory_space<vmem>>, vector<1x16x32xbf16>
    %34 = vector.shape_cast %33 : vector<1x16x32xbf16> to vector<16x32xbf16>
    %35 = vector.shape_cast %32 : vector<16x32xbf16> to vector<1x16x32xbf16>
    tpu.vector_store %arg8[%c0_18, %c0_19, %c0_20], %35 {strides = array<i32>} : memref<1x16x32xbf16, #tpu.memory_space<vmem>>, vector<1x16x32xbf16>,
    %c0_21 = arith.constant 0 : index
    %c0_22 = arith.constant 0 : index
    %36 = vector.load %arg7[%c0_21, %c0_22] : memref<32x32xbf16, #tpu.memory_space<vmem>>, vector<32x32xbf16>
    %cst_23 = arith.constant dense<0.000000e+00> : vector<16x32xf32>
    %37 = tpu.matmul %29, %36, %cst_23 {dimension_numbers = #tpu.dot_dimension_numbers<[1], [0], [0], [1], [0, 0, 1, 1], [], []>} : vector<16x32xbf16>, vector<32x32xbf16>, vector<16x32xf32> -> vector<16x32xf32>
    %38 = arith.truncf %37 : vector<16x32xf32> to vector<16x32xbf16>
    %c0_24 = arith.constant 0 : index
    %c0_25 = arith.constant 0 : index
    %c0_26 = arith.constant 0 : index
    %39 = vector.load %arg9[%c0_24, %c0_25, %c0_26] : memref<1x16x32xbf16, #tpu.memory_space<vmem>>, vector<1x16x32xbf16>
    %40 = vector.shape_cast %39 : vector<1x16x32xbf16> to vector<16x32xbf16>
    %41 = vector.shape_cast %38 : vector<16x32xbf16> to vector<1x16x32xbf16>
    tpu.vector_store %arg9[%c0_24, %c0_25, %c0_26], %41 {strides = array<i32>} : memref<1x16x32xbf16, #tpu.memory_space<vmem>>, vector<1x16x32xbf16>,
    return
  }
  func.func @transform_0(%arg0: i32) -> (i32, i32, i32) {
    %c0_i32 = arith.constant 0 : i32
    %c0_i32_0 = arith.constant 0 : i32
    %c0_i32_1 = arith.constant 0 : i32
    return %arg0, %c0_i32, %c0_i32_0 : i32, i32, i32
  }
  func.func @transform_1(%arg0: i32) -> (i32, i32) {
    %c0_i32 = arith.constant 0 : i32
    %c0_i32_0 = arith.constant 0 : i32
    %c0_i32_1 = arith.constant 0 : i32
    return %c0_i32, %c0_i32_0 : i32, i32
  }
  func.func @transform_2(%arg0: i32) -> (i32, i32) {
    %c0_i32 = arith.constant 0 : i32
    %c0_i32_0 = arith.constant 0 : i32
    %c0_i32_1 = arith.constant 0 : i32
    return %c0_i32, %c0_i32_0 : i32, i32
  }
  func.func @transform_3(%arg0: i32) -> (i32, i32) {
    %c0_i32 = arith.constant 0 : i32
    %c0_i32_0 = arith.constant 0 : i32
    %c0_i32_1 = arith.constant 0 : i32
    return %c0_i32, %c0_i32_0 : i32, i32
  }
  func.func @transform_4(%arg0: i32) -> (i32, i32) {
    %c0_i32 = arith.constant 0 : i32
    %c0_i32_0 = arith.constant 0 : i32
    %c0_i32_1 = arith.constant 0 : i32
    return %c0_i32, %c0_i32_0 : i32, i32
  }
  func.func @transform_5(%arg0: i32) -> (i32, i32) {
    %c0_i32 = arith.constant 0 : i32
    %c0_i32_0 = arith.constant 0 : i32
    %c0_i32_1 = arith.constant 0 : i32
    return %c0_i32, %c0_i32_0 : i32, i32
  }
  func.func @transform_6(%arg0: i32) -> (i32, i32) {
    %c0_i32 = arith.constant 0 : i32
    %c0_i32_0 = arith.constant 0 : i32
    %c0_i32_1 = arith.constant 0 : i32
    return %c0_i32, %c0_i32_0 : i32, i32
  }
  func.func @transform_7(%arg0: i32) -> (i32, i32, i32) {
    %c0_i32 = arith.constant 0 : i32
    %c0_i32_0 = arith.constant 0 : i32
    %c0_i32_1 = arith.constant 0 : i32
    return %arg0, %c0_i32, %c0_i32_0 : i32, i32, i32
  }
  func.func @transform_8(%arg0: i32) -> (i32, i32, i32) {
    %c0_i32 = arith.constant 0 : i32
    %c0_i32_0 = arith.constant 0 : i32
    %c0_i32_1 = arith.constant 0 : i32
    return %arg0, %c0_i32, %c0_i32_0 : i32, i32, i32
  }
}

</mosaic_0001>

<bundles_post_ra>
// kernel: tpu_custom_call.1
= control target key start
LH: loop header
LB: loop body
LE: loop exit
PB: predicated region body
PF: predicated region fallthrough
CT: control target
= control target key end

     0   :  { %s1126_s0 = inlined_call_operand.vmem [shape: bf16[2,16,128], index: 0, kind: input, shape index: {}]   ;;  %s1127_s1 = inlined_call_operand.vmem [shape: bf16[128,32], index: 1, kind: input, shape index: {}]   ;;  %s1128_s2 = inlined_call_operand.vmem [shape: f32[1,32], index: 2, kind: input, shape index: {}]   ;;  %s1129_s3 = inlined_call_operand.vmem [shape: f32[1,32], index: 3, kind: input, shape index: {}]   ;;  %s1130_s4 = inlined_call_operand.vmem [shape: f32[1,32], index: 4, kind: input, shape index: {}]   ;;  %s1131_s5 = inlined_call_operand.vmem [shape: bf16[32,32], index: 5, kind: input, shape index: {}]   ;;  %s1132_s6 = inlined_call_operand.vmem [shape: bf16[32,32], index: 6, kind: input, shape index: {}]   ;;  %s1133_s7 = inlined_call_operand.hbm [shape: bf16[2,16,32], index: 7, kind: output, shape index: {0}]   ;;  %s1134_s8 = inlined_call_operand.hbm [shape: bf16[2,16,32], index: 8, kind: output, shape index: {1}]  }
   0x1   :  { %1135 = sst [smem:[#allocation8_spill]] %s1126_s0 }
   0x2   :  { %1136 = sst [smem:[#allocation9_spill]] %s1127_s1 }
   0x3   :  { %14 = vsyncpa [#allocation3], 0 }
   0x4   :  { %16 = vsyncpa [#allocation3 + $0x1], 0 }
   0x5   :  { %17 = vsyncpa [#allocation5], 0 }
   0x6   :  { %19 = vsyncpa [#allocation5 + $0x1], 0  ;;  %s962_s27 = smov 0   ;;  %s964_s28 = smov 0  }
   0x7   :  { %s966_s29 = smov 0   ;;  %s968_s30 = smov 0  }
   0x8 LB: > { %s983_s9 = sadd.s32 4294967295, %s912_s30   ;;  %s676_s10 = sadd.s32 4294967294, %s912_s30   ;;  %s912_s30 = sphi %s968_s30, %s1144_s30   ;;  %s908_s29 = sphi %s966_s29, %s1143_s29   ;;  %s904_s28 = sphi %s964_s28, %s1142_s28   ;;  %s900_s27 = sphi %s962_s27, %s1141_s27  }
   0x9   : > { %s987_s11 = sadd.s32 1, %s912_s30   ;;  %s184_s12 = sadd.s32 1, %s908_s29 }
   0xa   : > { %s181_s13 = ssub.s32 %s912_s30, %s987_s11  ;;  %p194_p0 = scmp.ne.s32.totalorder %s908_s29, %s904_s28 }
   0xb   : > { %p182_p1 = scmp.eq.s32.totalorder %s181_s13, 0  ;;  %p195_p2 = scmp.eq.s32.totalorder %s983_s9, 1 }
   0xc   : > { %p200_p3 = scmp.ne.s32.totalorder %s904_s28, %s900_s27  ;;  %p201_p4 = scmp.eq.s32.totalorder %s676_s10, 1 }
   0xd   : > { %s998_s14 = scalar_select %p182_p1, %s908_s29, %s184_s12  }
   0xe   : > { %p1000_p5 = por %p195_p2, %p194_p0  ;;  %p1004_p6 = por %p201_p4, %p200_p3 }
   0xf   : > { %p679_p7 = scmp.ge.s32.totalorder %s912_s30, 1  ;;  %p271_p8 = scmp.lt.s32.totalorder %s912_s30, 3 }
  0x11   : > { %p272_p9 = pnand %p679_p7, %p271_p8 }
  0x12   : > { %s1139_s1 = sld [smem:[#allocation9_spill]] (!%p272_p9)  ;;  %p310_p10 = scmp.lt.s32.totalorder (!%p272_p9), %s983_s9, 1 }
  0x13   : > { %275 = sbr.rel (%p272_p9) target bundleno = 614 (0x266), region = 48  ;;  %s1140_s0 = sld [smem:[#allocation8_spill]] (!%p272_p9) }
  0x14   : > { %s1067_s26 = sand.u32 (!%p272_p9), 1, %s904_s28   ;;  %s760_s12 = sshll.u32 (!%p272_p9), %s983_s9, 3 }
  0x15   : > { %s680_s10 = sshll.u32 (!%p272_p9), %s1067_s26, 3  ;;  %s560_s18 = scalar_lea.hbm (!%p272_p9), %s1133_s7, %s760_s12 }
  0x16   : > { %s563_s21 = sshll.u32 (!%p272_p9), %s560_s18, 4  ;;  %s1080_s23 = scalar_lea.hbm (!%p272_p9), %s1134_s8, %s760_s12  ;;  %s564_s21 = int_to_ptr.hbm [resolvable:$true] %s563_s21 }
  0x17   : > { %s544_s17 = scalar_lea.sflag (!%p272_p9), [#allocation3], %s1067_s26  ;;  %s832_s18 = sshra.s32 (!%p272_p9), %s564_s21, 4  ;;  %s833_s18 = int_to_ptr.hbm [resolvable:$true] %s832_s18 }
  0x18   : > { %v755_v0 = vld [vmem:[%s1139_s1 + $0x38] sm:$0xff]  ;;  %v754_v1 = vld [vmem:[%s1139_s1 + $0x30] sm:$0xff]  ;;  %v753_v2 = vld [vmem:[%s1139_s1 + $0x28] sm:$0xff]  ;;  %s311_s13 = scalar_select %p310_p10, %s983_s9, 1  ;;  %vm406_vm0 = vcmask 261120   ;;  %v914_v16 = vmov 32.0  }
  0x19   : > { %392 = vmatpush.bf16.msra.mxu0 %v755_v0  ;;  %v752_v3 = vld [vmem:[%s1139_s1 + $0x20] sm:$0xff]  ;;  %v751_v4 = vld [vmem:[%s1139_s1 + $0x18] sm:$0xff]  ;;  %v750_v5 = vld [vmem:[%s1139_s1 + $0x10] sm:$0xff]  ;;  %812 = vrcp.f32 %v914_v16  ;;  %vm506_vm8 = vcmask 257024   ;;  %s838_s9 = scalar_lea.hbm %s1133_s7, 16  ;;  %p839_p0 = scmp.lt.s32.totalorder %s833_s18, %s1133_s7 }
  0x1a   : > { %v749_v6 = vld [vmem:[%s1139_s1 + $0x8] sm:$0xff]  ;;  %s746_s19 = sshll.u32 %s311_s13, 3  ;;  %v748_v7 = vld [vmem:[%s1139_s1] sm:$0xff]  ;;  %s580_s13 = sshll.u32 %s1080_s23, 4  ;;  %s581_s13 = int_to_ptr.hbm [resolvable:$true] %s580_s13 }
  0x1b   : > { %s314_s24 = scalar_lea.vmem %s1140_s0, %s746_s19  ;;  %v809_v9 = vld [vmem:[%s1128_s2] ss:$0 sm:$0xff]  ;;  %v757_v33 = vld [vmem:[%s1131_s5 + $0x8] sm:$0xff]  ;;  %s302_s19 = scalar_lea.vmem [#allocation2], %s680_s10 }
  0x1c   : > { %v747_v8 = vld [vmem:[%s314_s24] sm:$0xff]  ;;  %v759_v34 = vld [vmem:[%s1132_s6 + $0x8] sm:$0xff]  ;;  %496 = vmatpush.bf16.msra.mxu1 %v757_v33  ;;  %s561_s20 = sshll.u32 %s302_s19, 4  ;;  %s309_s24 = scalar_lea.vmem [#allocation4], %s680_s10  ;;  %s1075_s20 = int_to_ptr.vmem [resolvable:$true] %s561_s20 }
  0x1d   : > { %393 = vmatpush.bf16.msra.mxu0 %v754_v1  ;;  %531 = vmatpush.bf16.msra.mxu2 %v759_v34  ;;  %v756_v36 = vld [vmem:[%s1131_s5] sm:$0xff]  ;;  %s578_s25 = sshll.u32 %s309_s24, 4  ;;  %s834_s0 = scalar_lea.hbm %s833_s18, 8  ;;  %s579_s25 = int_to_ptr.vmem [resolvable:$true] %s578_s25 }
  0x1e   : > { %v758_v37 = vld [vmem:[%s1132_s6] sm:$0xff]  ;;  %p835_p11 = scmp.ne.s32.totalorder %s833_s18, %s834_s0  ;;  %p840_p1 = scmp.lt.s32.totalorder %s838_s9, %s834_s0 }
  0x1f   : > { %v813_v17 = vpop.eup %812  ;;  %v810_v56 = vld [vmem:[%s1129_s3] ss:$0 sm:$0xff] }
  0x20   : > { %v414_v18 = vmul.f32 32.0, %v813_v17  ;;  %vm418_vm1 = vweird.f32 %v813_v17  ;;  %497 = vmatpush.bf16.msra.mxu1 %v756_v36  ;;  %v811_v61 = vld [vmem:[%s1130_s4] ss:$0 sm:$0xff]  ;;  %p836_p12 = pnand %p835_p11, %p1000_p5  ;;  %p841_p2 = por %p840_p1, %p839_p0 }
  0x21   : > { %394 = vmatpush.bf16.msra.mxu0 %v753_v2  ;;  %532 = vmatpush.bf16.msra.mxu2 %v758_v37 }
  0x22   : > { %v415_v19 = vsub.f32 1.0, %v414_v18  ;;  %p837_p13 = pneg %p836_p12 }
  0x24   : > { %v416_v20 = vmul.f32 %v813_v17, %v415_v19  ;;  %p842_p3 = pnand %p841_p2, %p837_p13 }
  0x25   : > { %395 = vmatpush.bf16.msra.mxu0 %v752_v3 }
  0x26   : > { %v417_v21 = vadd.f32 %v813_v17, %v416_v20 }
  0x28   : > { %v419_v22 = vsel %vm418_vm1, %v813_v17, %v417_v21 }
  0x29   : > { %396 = vmatpush.bf16.msra.mxu0 %v751_v4 }
  0x2d   : > { %397 = vmatpush.bf16.msra.mxu0 %v750_v5 }
  0x31   : > { %398 = vmatpush.bf16.msra.mxu0 %v749_v6 }
  0x35   : > { %399 = vmatpush.bf16.msra.mxu0 %v748_v7 }
  0x38   : > { %400 = vmatmul.bf16.vlgmr.msra.gmra.mxu0 %v747_v8 }
  0xb5   : > { %v401_v10 = vpop.f32.mrf.mxu0 }
  0xb6   : > { %v402_v11 = vadd.f32 %v809_v9, %v401_v10 }
  0xb8   : > { %v407_v12 = vsel %vm406_vm0, %v402_v11, 0.0 }
  0xb9   : > { %408 = vadd.xlane.f32.xlu0 %v407_v12 }
  0xbd   : > { %v403_v13 = vpop.f32.mrf.mxu0 }
  0xbe   : > { %v404_v14 = vadd.f32 %v809_v9, %v403_v13 }
  0xc0   : > { %v410_v15 = vsel %vm406_vm0, %v404_v14, 0.0 }
  0xc1   : > { %411 = vadd.xlane.f32.xlu0 %v410_v15 }
 0x12c   : > { %v409_v23 = vpop.xlane.xlu0 %408 }
 0x12d   : > { %v420_v24 = vmul.f32 %v419_v22, %v409_v23 }
 0x12f   : > { %v422_v25 = vsub.f32 %v402_v11, %v420_v24 }
 0x131   : > { %v424_v26 = vmul.f32 %v422_v25, %v422_v25 }
 0x133   : > { %v426_v27 = vsel %vm406_vm0, %v424_v26, 0.0 }
 0x134   : > { %427 = vadd.xlane.f32.xlu1 %v426_v27  ;;  %v412_v28 = vpop.xlane.xlu0 %411 }
 0x135   : > { %v421_v29 = vmul.f32 %v419_v22, %v412_v28 }
 0x137   : > { %v423_v30 = vsub.f32 %v404_v14, %v421_v29 }
 0x139   : > { %v425_v31 = vmul.f32 %v423_v30, %v423_v30 }
 0x13b   : > { %v429_v32 = vsel %vm406_vm0, %v425_v31, 0.0 }
 0x13c   : > { %430 = vadd.xlane.f32.xlu1 %v429_v32 }
 0x1a7   : > { %v428_v35 = vpop.xlane.xlu1 %427 }
 0x1a8   : > { %v432_v38 = vmul.f32 %v428_v35, %v419_v22 }
 0x1aa   : > { %v434_v39 = vadd.f32 1e-05, %v432_v38 }
 0x1ac   : > { %814 = vrsqrt.f32 %v434_v39  ;;  %vm442_vm3 = vweird.f32 %v434_v39 }
 0x1af   : > { %v431_v40 = vpop.xlane.xlu1 %430 }
 0x1b0   : > { %v433_v41 = vmul.f32 %v431_v40, %v419_v22 }
 0x1b2   : > { %v815_v42 = vpop.eup %814  ;;  %v435_v43 = vadd.f32 1e-05, %v433_v41 }
 0x1b3   : > { %v437_v44 = vmul.f32 %v815_v42, %v434_v39  ;;  %vm443_vm2 = vweird.f32 %v815_v42 }
 0x1b4   : > { %816 = vrsqrt.f32 %v435_v43  ;;  %vm444_vm4 = vmor %vm442_vm3, %vm443_vm2  ;;  %vm452_vm6 = vweird.f32 %v435_v43 }
 0x1b5   : > { %v438_v45 = vmul.f32 %v815_v42, %v437_v44 }
 0x1b7   : > { %v439_v46 = vmul.f32 0.5, %v438_v45 }
 0x1b9   : > { %v440_v47 = vsub.f32 1.5, %v439_v46 }
 0x1ba   : > { %v817_v48 = vpop.eup %816 }
 0x1bb   : > { %v441_v49 = vmul.f32 %v815_v42, %v440_v47  ;;  %v447_v50 = vmul.f32 %v817_v48, %v435_v43  ;;  %vm453_vm5 = vweird.f32 %v817_v48 }
 0x1bc   : > { %vm454_vm7 = vmor %vm452_vm6, %vm453_vm5 }
 0x1bd   : > { %v448_v51 = vmul.f32 %v817_v48, %v447_v50  ;;  %v445_v52 = vsel %vm444_vm4, %v815_v42, %v441_v49 }
 0x1be   : > { %v456_v55 = vmul.f32 %v445_v52, %v422_v25 }
 0x1bf   : > { %v449_v53 = vmul.f32 0.5, %v448_v51 }
 0x1c0   : > { %v462_v60 = vmul.f32 %v810_v56, %v456_v55 }
 0x1c1   : > { %v450_v54 = vsub.f32 1.5, %v449_v53 }
 0x1c2   : > { %v468_v63 = vadd.f32 %v811_v61, %v462_v60 }
 0x1c3   : > { %v451_v57 = vmul.f32 %v817_v48, %v450_v54 }
 0x1c5   : > { %v455_v58 = vsel %vm454_vm7, %v817_v48, %v451_v57 }
 0x1c6   : > { %v457_v59 = vmul.f32 %v455_v58, %v423_v30 }
 0x1c8   : > { %v463_v62 = vmul.f32 %v810_v56, %v457_v59 }
 0x1ca   : > { %v469_v0 = vadd.f32 %v811_v61, %v463_v62 }
 0x1cc   : > { %v470_v1 = vpack.c.bf16 %v469_v0, %v468_v63 }
 0x1ce   : > { %728 = vmatmul.msk.bf16.vlgmr.msra.gmra.mxu1 %vm406_vm0, %v470_v1  ;;  %737 = vmatmul.msk.bf16.vlgmr.msra.gmra.mxu2 %vm406_vm0, %v470_v1 }
 0x24b   : > { %v499_v2 = vpop.f32.mrf.mxu1 }
 0x24c   : > { %v504_v3 = vpack.c.bf16 %v499_v2, %v499_v2 }
 0x24e   : > { %507 = vst.msk [vmem:[%s302_s19] sm:$0xf] %vm506_vm8, %v504_v3 }
 0x251   : > { %v534_v4 = vpop.f32.mrf.mxu2 }
 0x252   : > { %v539_v5 = vpack.c.bf16 %v534_v4, %v534_v4 }
 0x253   : > { %v501_v6 = vpop.f32.mrf.mxu1 }
 0x254   : > { %541 = vst.msk [vmem:[%s309_s24] sm:$0xf] %vm506_vm8, %v539_v5  ;;  %v505_v7 = vpack.c.bf16 %v501_v6, %v501_v6 }
 0x256   : > { %508 = vst.msk [vmem:[%s302_s19 + $0x4] sm:$0xf] %vm506_vm8, %v505_v7 }
 0x257   : > { %845 = shalt.err (!%p842_p3)
}
 0x258   : > { %s915_s19 = smov 64   ;;  %s916_s23 = smov 4  }
 0x259   : > { %762 = dma.vmem_to_hbm [thread:$0]  (%p1000_p5), %s1075_s20, 128, %s564_s21, %s544_s17, %s915_s19, %s915_s19, %s916_s23   ;;  %v536_v8 = vpop.f32.mrf.mxu2 }
 0x25a   : > { %v540_v9 = vpack.c.bf16 %v536_v8, %v536_v8  ;;  %s549_s1 = scalar_lea.sflag [#allocation5], %s1067_s26  ;;  %s860_s18 = sshra.s32 %s581_s13, 4  ;;  %s861_s18 = int_to_ptr.hbm [resolvable:$true] %s860_s18 }
 0x25b   : > { %s862_s0 = scalar_lea.hbm %s861_s18, 8  ;;  %s866_s9 = scalar_lea.hbm %s1134_s8, 16 }
 0x25c   : > { %542 = vst.msk [vmem:[%s309_s24 + $0x4] sm:$0xf] %vm506_vm8, %v540_v9  ;;  %p863_p4 = scmp.ne.s32.totalorder %s861_s18, %s862_s0  ;;  %p867_p9 = scmp.lt.s32.totalorder %s861_s18, %s1134_s8 }
 0x25d   : > { %p868_p10 = scmp.lt.s32.totalorder %s866_s9, %s862_s0 }
 0x25e   : > { %p864_p7 = pnand %p863_p4, %p1000_p5 }
 0x25f   : > { %p869_p11 = por %p868_p10, %p867_p9 }
 0x260   : > { %p865_p8 = pneg %p864_p7 }
 0x262   : > { %p870_p12 = pnand %p869_p11, %p865_p8 }
 0x264   : > { %873 = shalt.err (!%p870_p12)
}
 0x265   : > { %763 = dma.vmem_to_hbm [thread:$0]  (%p1000_p5), %s579_s25, 128, %s581_s13, %s549_s1, %s915_s19, %s915_s19, %s916_s23  }
 0x266 PF: > { %p773_p13 = scmp.ge.s32.totalorder %s912_s30, 2  ;;  %s595_s26 = sand.u32 1, %s900_s27  }
 0x267   : > { %s596_s21 = scalar_lea.sflag [#allocation3], %s595_s26 }
 0x268   : > { %p767_p0 = pnand %p773_p13, %p1004_p6 }
 0x26a   : > { %p768_p1 = pneg %p767_p0 }
 0x26c   : > { %891 = dma.done.wait (%p768_p1), %s596_s21, 128  }
 0x26d   : > { %893 = vsyncadd (%p768_p1), %s596_s21, 4294967168  ;;  %s606_s24 = scalar_lea.sflag [#allocation5], %s595_s26 }
 0x26e   : > { %895 = dma.done.wait (%p768_p1), %s606_s24, 128  }
 0x26f   : > { %897 = vsyncadd (%p768_p1), %s606_s24, 4294967168  ;;  %p22_p5 = scmp.ge.s32.totalorder %s987_s11, 4   ;;  %s1141_s27 = smov %s904_s28 }
 0x270   : > { %s1142_s28 = smov %s908_s29  ;;  %s1143_s29 = smov %s998_s14 }
 0x271   : > { %s1144_s30 = smov %s987_s11  ;;  %24 = sbr.rel (!%p22_p5) target bundleno = 8 (0x8), region = 100 }
 0x276   :  { %612 = vsyncpa [#allocation3], 1 }
 0x277   :  { %614 = vsyncpa [#allocation3 + $0x1], 1 }
 0x278   :  { %615 = vsyncpa [#allocation5], 1 }
 0x279   :  { %617 = vsyncpa [#allocation5 + $0x1], 1 }

// kernel: tpu_custom_call.1
= control target key start
LH: loop header
LB: loop body
LE: loop exit
PB: predicated region body
PF: predicated region fallthrough
CT: control target
= control target key end

     0   :  { %s1126_s0 = inlined_call_operand.vmem [shape: bf16[2,16,128], index: 0, kind: input, shape index: {}]   ;;  %s1127_s1 = inlined_call_operand.vmem [shape: bf16[128,32], index: 1, kind: input, shape index: {}]   ;;  %s1128_s2 = inlined_call_operand.vmem [shape: f32[1,32], index: 2, kind: input, shape index: {}]   ;;  %s1129_s3 = inlined_call_operand.vmem [shape: f32[1,32], index: 3, kind: input, shape index: {}]   ;;  %s1130_s4 = inlined_call_operand.vmem [shape: f32[1,32], index: 4, kind: input, shape index: {}]   ;;  %s1131_s5 = inlined_call_operand.vmem [shape: bf16[32,32], index: 5, kind: input, shape index: {}]   ;;  %s1132_s6 = inlined_call_operand.vmem [shape: bf16[32,32], index: 6, kind: input, shape index: {}]   ;;  %s1133_s7 = inlined_call_operand.hbm [shape: bf16[2,16,32], index: 7, kind: output, shape index: {0}]   ;;  %s1134_s8 = inlined_call_operand.hbm [shape: bf16[2,16,32], index: 8, kind: output, shape index: {1}]  }
   0x1   :  { %1135 = sst [smem:[#allocation8_spill]] %s1126_s0 }
   0x2   :  { %1136 = sst [smem:[#allocation9_spill]] %s1127_s1 }
   0x3   :  { %14 = vsyncpa [#allocation3], 0 }
   0x4   :  { %16 = vsyncpa [#allocation3 + $0x1], 0 }
   0x5   :  { %17 = vsyncpa [#allocation5], 0 }
   0x6   :  { %19 = vsyncpa [#allocation5 + $0x1], 0  ;;  %s962_s27 = smov 0   ;;  %s964_s28 = smov 0  }
   0x7   :  { %s966_s29 = smov 0   ;;  %s968_s30 = smov 0  }
   0x8 LB: > { %s983_s9 = sadd.s32 4294967295, %s912_s30   ;;  %s676_s10 = sadd.s32 4294967294, %s912_s30   ;;  %s912_s30 = sphi %s968_s30, %s1144_s30   ;;  %s908_s29 = sphi %s966_s29, %s1143_s29   ;;  %s904_s28 = sphi %s964_s28, %s1142_s28   ;;  %s900_s27 = sphi %s962_s27, %s1141_s27  }
   0x9   : > { %s987_s11 = sadd.s32 1, %s912_s30   ;;  %s184_s12 = sadd.s32 1, %s908_s29 }
   0xa   : > { %s181_s13 = ssub.s32 %s912_s30, %s987_s11  ;;  %p194_p0 = scmp.ne.s32.totalorder %s908_s29, %s904_s28 }
   0xb   : > { %p182_p1 = scmp.eq.s32.totalorder %s181_s13, 0  ;;  %p195_p2 = scmp.eq.s32.totalorder %s983_s9, 1 }
   0xc   : > { %p200_p3 = scmp.ne.s32.totalorder %s904_s28, %s900_s27  ;;  %p201_p4 = scmp.eq.s32.totalorder %s676_s10, 1 }
   0xd   : > { %s998_s14 = scalar_select %p182_p1, %s908_s29, %s184_s12  }
   0xe   : > { %p1000_p5 = por %p195_p2, %p194_p0  ;;  %p1004_p6 = por %p201_p4, %p200_p3 }
   0xf   : > { %p679_p7 = scmp.ge.s32.totalorder %s912_s30, 1  ;;  %p271_p8 = scmp.lt.s32.totalorder %s912_s30, 3 }
  0x11   : > { %p272_p9 = pnand %p679_p7, %p271_p8 }
  0x12   : > { %s1139_s1 = sld [smem:[#allocation9_spill]] (!%p272_p9)  ;;  %p310_p10 = scmp.lt.s32.totalorder (!%p272_p9), %s983_s9, 1 }
  0x13   : > { %275 = sbr.rel (%p272_p9) target bundleno = 614 (0x266), region = 48  ;;  %s1140_s0 = sld [smem:[#allocation8_spill]] (!%p272_p9) }
  0x14   : > { %s1067_s26 = sand.u32 (!%p272_p9), 1, %s904_s28   ;;  %s760_s12 = sshll.u32 (!%p272_p9), %s983_s9, 3 }
  0x15   : > { %s680_s10 = sshll.u32 (!%p272_p9), %s1067_s26, 3  ;;  %s560_s18 = scalar_lea.hbm (!%p272_p9), %s1133_s7, %s760_s12 }
  0x16   : > { %s563_s21 = sshll.u32 (!%p272_p9), %s560_s18, 4  ;;  %s1080_s23 = scalar_lea.hbm (!%p272_p9), %s1134_s8, %s760_s12  ;;  %s564_s21 = int_to_ptr.hbm [resolvable:$true] %s563_s21 }
  0x17   : > { %s544_s17 = scalar_lea.sflag (!%p272_p9), [#allocation3], %s1067_s26  ;;  %s832_s18 = sshra.s32 (!%p272_p9), %s564_s21, 4  ;;  %s833_s18 = int_to_ptr.hbm [resolvable:$true] %s832_s18 }
  0x18   : > { %v755_v0 = vld [vmem:[%s1139_s1 + $0x38] sm:$0xff]  ;;  %v754_v1 = vld [vmem:[%s1139_s1 + $0x30] sm:$0xff]  ;;  %v753_v2 = vld [vmem:[%s1139_s1 + $0x28] sm:$0xff]  ;;  %s311_s13 = scalar_select %p310_p10, %s983_s9, 1  ;;  %vm406_vm0 = vcmask 261120   ;;  %v914_v16 = vmov 32.0  }
  0x19   : > { %392 = vmatpush.bf16.msra.mxu0 %v755_v0  ;;  %v752_v3 = vld [vmem:[%s1139_s1 + $0x20] sm:$0xff]  ;;  %v751_v4 = vld [vmem:[%s1139_s1 + $0x18] sm:$0xff]  ;;  %v750_v5 = vld [vmem:[%s1139_s1 + $0x10] sm:$0xff]  ;;  %812 = vrcp.f32 %v914_v16  ;;  %vm506_vm8 = vcmask 257024   ;;  %s838_s9 = scalar_lea.hbm %s1133_s7, 16  ;;  %p839_p0 = scmp.lt.s32.totalorder %s833_s18, %s1133_s7 }
  0x1a   : > { %v749_v6 = vld [vmem:[%s1139_s1 + $0x8] sm:$0xff]  ;;  %s746_s19 = sshll.u32 %s311_s13, 3  ;;  %v748_v7 = vld [vmem:[%s1139_s1] sm:$0xff]  ;;  %s580_s13 = sshll.u32 %s1080_s23, 4  ;;  %s581_s13 = int_to_ptr.hbm [resolvable:$true] %s580_s13 }
  0x1b   : > { %s314_s24 = scalar_lea.vmem %s1140_s0, %s746_s19  ;;  %v809_v9 = vld [vmem:[%s1128_s2] ss:$0 sm:$0xff]  ;;  %v757_v33 = vld [vmem:[%s1131_s5 + $0x8] sm:$0xff]  ;;  %s302_s19 = scalar_lea.vmem [#allocation2], %s680_s10 }
  0x1c   : > { %v747_v8 = vld [vmem:[%s314_s24] sm:$0xff]  ;;  %v759_v34 = vld [vmem:[%s1132_s6 + $0x8] sm:$0xff]  ;;  %496 = vmatpush.bf16.msra.mxu1 %v757_v33  ;;  %s561_s20 = sshll.u32 %s302_s19, 4  ;;  %s309_s24 = scalar_lea.vmem [#allocation4], %s680_s10  ;;  %s1075_s20 = int_to_ptr.vmem [resolvable:$true] %s561_s20 }
  0x1d   : > { %393 = vmatpush.bf16.msra.mxu0 %v754_v1  ;;  %531 = vmatpush.bf16.msra.mxu2 %v759_v34  ;;  %v756_v36 = vld [vmem:[%s1131_s5] sm:$0xff]  ;;  %s578_s25 = sshll.u32 %s309_s24, 4  ;;  %s834_s0 = scalar_lea.hbm %s833_s18, 8  ;;  %s579_s25 = int_to_ptr.vmem [resolvable:$true] %s578_s25 }
  0x1e   : > { %v758_v37 = vld [vmem:[%s1132_s6] sm:$0xff]  ;;  %p835_p11 = scmp.ne.s32.totalorder %s833_s18, %s834_s0  ;;  %p840_p1 = scmp.lt.s32.totalorder %s838_s9, %s834_s0 }
  0x1f   : > { %v813_v17 = vpop.eup %812  ;;  %v810_v56 = vld [vmem:[%s1129_s3] ss:$0 sm:$0xff] }
  0x20   : > { %v414_v18 = vmul.f32 32.0, %v813_v17  ;;  %vm418_vm1 = vweird.f32 %v813_v17  ;;  %497 = vmatpush.bf16.msra.mxu1 %v756_v36  ;;  %v811_v61 = vld [vmem:[%s1130_s4] ss:$0 sm:$0xff]  ;;  %p836_p12 = pnand %p835_p11, %p1000_p5  ;;  %p841_p2 = por %p840_p1, %p839_p0 }
  0x21   : > { %394 = vmatpush.bf16.msra.mxu0 %v753_v2  ;;  %532 = vmatpush.bf16.msra.mxu2 %v758_v37 }
  0x22   : > { %v415_v19 = vsub.f32 1.0, %v414_v18  ;;  %p837_p13 = pneg %p836_p12 }
  0x24   : > { %v416_v20 = vmul.f32 %v813_v17, %v415_v19  ;;  %p842_p3 = pnand %p841_p2, %p837_p13 }
  0x25   : > { %395 = vmatpush.bf16.msra.mxu0 %v752_v3 }
  0x26   : > { %v417_v21 = vadd.f32 %v813_v17, %v416_v20 }
  0x28   : > { %v419_v22 = vsel %vm418_vm1, %v813_v17, %v417_v21 }
  0x29   : > { %396 = vmatpush.bf16.msra.mxu0 %v751_v4 }
  0x2d   : > { %397 = vmatpush.bf16.msra.mxu0 %v750_v5 }
  0x31   : > { %398 = vmatpush.bf16.msra.mxu0 %v749_v6 }
  0x35   : > { %399 = vmatpush.bf16.msra.mxu0 %v748_v7 }
  0x38   : > { %400 = vmatmul.bf16.vlgmr.msra.gmra.mxu0 %v747_v8 }
  0xb5   : > { %v401_v10 = vpop.f32.mrf.mxu0 }
  0xb6   : > { %v402_v11 = vadd.f32 %v809_v9, %v401_v10 }
  0xb8   : > { %v407_v12 = vsel %vm406_vm0, %v402_v11, 0.0 }
  0xb9   : > { %408 = vadd.xlane.f32.xlu0 %v407_v12 }
  0xbd   : > { %v403_v13 = vpop.f32.mrf.mxu0 }
  0xbe   : > { %v404_v14 = vadd.f32 %v809_v9, %v403_v13 }
  0xc0   : > { %v410_v15 = vsel %vm406_vm0, %v404_v14, 0.0 }
  0xc1   : > { %411 = vadd.xlane.f32.xlu0 %v410_v15 }
 0x12c   : > { %v409_v23 = vpop.xlane.xlu0 %408 }
 0x12d   : > { %v420_v24 = vmul.f32 %v419_v22, %v409_v23 }
 0x12f   : > { %v422_v25 = vsub.f32 %v402_v11, %v420_v24 }
 0x131   : > { %v424_v26 = vmul.f32 %v422_v25, %v422_v25 }
 0x133   : > { %v426_v27 = vsel %vm406_vm0, %v424_v26, 0.0 }
 0x134   : > { %427 = vadd.xlane.f32.xlu1 %v426_v27  ;;  %v412_v28 = vpop.xlane.xlu0 %411 }
 0x135   : > { %v421_v29 = vmul.f32 %v419_v22, %v412_v28 }
 0x137   : > { %v423_v30 = vsub.f32 %v404_v14, %v421_v29 }
 0x139   : > { %v425_v31 = vmul.f32 %v423_v30, %v423_v30 }
 0x13b   : > { %v429_v32 = vsel %vm406_vm0, %v425_v31, 0.0 }
 0x13c   : > { %430 = vadd.xlane.f32.xlu1 %v429_v32 }
 0x1a7   : > { %v428_v35 = vpop.xlane.xlu1 %427 }
 0x1a8   : > { %v432_v38 = vmul.f32 %v428_v35, %v419_v22 }
 0x1aa   : > { %v434_v39 = vadd.f32 1e-05, %v432_v38 }
 0x1ac   : > { %814 = vrsqrt.f32 %v434_v39  ;;  %vm442_vm3 = vweird.f32 %v434_v39 }
 0x1af   : > { %v431_v40 = vpop.xlane.xlu1 %430 }
 0x1b0   : > { %v433_v41 = vmul.f32 %v431_v40, %v419_v22 }
 0x1b2   : > { %v815_v42 = vpop.eup %814  ;;  %v435_v43 = vadd.f32 1e-05, %v433_v41 }
 0x1b3   : > { %v437_v44 = vmul.f32 %v815_v42, %v434_v39  ;;  %vm443_vm2 = vweird.f32 %v815_v42 }
 0x1b4   : > { %816 = vrsqrt.f32 %v435_v43  ;;  %vm444_vm4 = vmor %vm442_vm3, %vm443_vm2  ;;  %vm452_vm6 = vweird.f32 %v435_v43 }
 0x1b5   : > { %v438_v45 = vmul.f32 %v815_v42, %v437_v44 }
 0x1b7   : > { %v439_v46 = vmul.f32 0.5, %v438_v45 }
 0x1b9   : > { %v440_v47 = vsub.f32 1.5, %v439_v46 }
 0x1ba   : > { %v817_v48 = vpop.eup %816 }
 0x1bb   : > { %v441_v49 = vmul.f32 %v815_v42, %v440_v47  ;;  %v447_v50 = vmul.f32 %v817_v48, %v435_v43  ;;  %vm453_vm5 = vweird.f32 %v817_v48 }
 0x1bc   : > { %vm454_vm7 = vmor %vm452_vm6, %vm453_vm5 }
 0x1bd   : > { %v448_v51 = vmul.f32 %v817_v48, %v447_v50  ;;  %v445_v52 = vsel %vm444_vm4, %v815_v42, %v441_v49 }
 0x1be   : > { %v456_v55 = vmul.f32 %v445_v52, %v422_v25 }
 0x1bf   : > { %v449_v53 = vmul.f32 0.5, %v448_v51 }
 0x1c0   : > { %v462_v60 = vmul.f32 %v810_v56, %v456_v55 }
 0x1c1   : > { %v450_v54 = vsub.f32 1.5, %v449_v53 }
 0x1c2   : > { %v468_v63 = vadd.f32 %v811_v61, %v462_v60 }
 0x1c3   : > { %v451_v57 = vmul.f32 %v817_v48, %v450_v54 }
 0x1c5   : > { %v455_v58 = vsel %vm454_vm7, %v817_v48, %v451_v57 }
 0x1c6   : > { %v457_v59 = vmul.f32 %v455_v58, %v423_v30 }
 0x1c8   : > { %v463_v62 = vmul.f32 %v810_v56, %v457_v59 }
 0x1ca   : > { %v469_v0 = vadd.f32 %v811_v61, %v463_v62 }
 0x1cc   : > { %v470_v1 = vpack.c.bf16 %v469_v0, %v468_v63 }
 0x1ce   : > { %728 = vmatmul.msk.bf16.vlgmr.msra.gmra.mxu1 %vm406_vm0, %v470_v1  ;;  %737 = vmatmul.msk.bf16.vlgmr.msra.gmra.mxu2 %vm406_vm0, %v470_v1 }
 0x24b   : > { %v499_v2 = vpop.f32.mrf.mxu1 }
 0x24c   : > { %v504_v3 = vpack.c.bf16 %v499_v2, %v499_v2 }
 0x24e   : > { %507 = vst.msk [vmem:[%s302_s19] sm:$0xf] %vm506_vm8, %v504_v3 }
 0x251   : > { %v534_v4 = vpop.f32.mrf.mxu2 }
 0x252   : > { %v539_v5 = vpack.c.bf16 %v534_v4, %v534_v4 }
 0x253   : > { %v501_v6 = vpop.f32.mrf.mxu1 }
 0x254   : > { %541 = vst.msk [vmem:[%s309_s24] sm:$0xf] %vm506_vm8, %v539_v5  ;;  %v505_v7 = vpack.c.bf16 %v501_v6, %v501_v6 }
 0x256   : > { %508 = vst.msk [vmem:[%s302_s19 + $0x4] sm:$0xf] %vm506_vm8, %v505_v7 }
 0x257   : > { %845 = shalt.err (!%p842_p3)
}
 0x258   : > { %s915_s19 = smov 64   ;;  %s916_s23 = smov 4  }
 0x259   : > { %762 = dma.vmem_to_hbm [thread:$0]  (%p1000_p5), %s1075_s20, 128, %s564_s21, %s544_s17, %s915_s19, %s915_s19, %s916_s23   ;;  %v536_v8 = vpop.f32.mrf.mxu2 }
 0x25a   : > { %v540_v9 = vpack.c.bf16 %v536_v8, %v536_v8  ;;  %s549_s1 = scalar_lea.sflag [#allocation5], %s1067_s26  ;;  %s860_s18 = sshra.s32 %s581_s13, 4  ;;  %s861_s18 = int_to_ptr.hbm [resolvable:$true] %s860_s18 }
 0x25b   : > { %s862_s0 = scalar_lea.hbm %s861_s18, 8  ;;  %s866_s9 = scalar_lea.hbm %s1134_s8, 16 }
 0x25c   : > { %542 = vst.msk [vmem:[%s309_s24 + $0x4] sm:$0xf] %vm506_vm8, %v540_v9  ;;  %p863_p4 = scmp.ne.s32.totalorder %s861_s18, %s862_s0  ;;  %p867_p9 = scmp.lt.s32.totalorder %s861_s18, %s1134_s8 }
 0x25d   : > { %p868_p10 = scmp.lt.s32.totalorder %s866_s9, %s862_s0 }
 0x25e   : > { %p864_p7 = pnand %p863_p4, %p1000_p5 }
 0x25f   : > { %p869_p11 = por %p868_p10, %p867_p9 }
 0x260   : > { %p865_p8 = pneg %p864_p7 }
 0x262   : > { %p870_p12 = pnand %p869_p11, %p865_p8 }
 0x264   : > { %873 = shalt.err (!%p870_p12)
}
 0x265   : > { %763 = dma.vmem_to_hbm [thread:$0]  (%p1000_p5), %s579_s25, 128, %s581_s13, %s549_s1, %s915_s19, %s915_s19, %s916_s23  }
 0x266 PF: > { %p773_p13 = scmp.ge.s32.totalorder %s912_s30, 2  ;;  %s595_s26 = sand.u32 1, %s900_s27  }
 0x267   : > { %s596_s21 = scalar_lea.sflag [#allocation3], %s595_s26 }
 0x268   : > { %p767_p0 = pnand %p773_p13, %p1004_p6 }
 0x26a   : > { %p768_p1 = pneg %p767_p0 }
 0x26c   : > { %891 = dma.done.wait (%p768_p1), %s596_s21, 128  }
 0x26d   : > { %893 = vsyncadd (%p768_p1), %s596_s21, 4294967168  ;;  %s606_s24 = scalar_lea.sflag [#allocation5], %s595_s26 }
 0x26e   : > { %895 = dma.done.wait (%p768_p1), %s606_s24, 128  }
 0x26f   : > { %897 = vsyncadd (%p768_p1), %s606_s24, 4294967168  ;;  %p22_p5 = scmp.ge.s32.totalorder %s987_s11, 4   ;;  %s1141_s27 = smov %s904_s28 }
 0x270   : > { %s1142_s28 = smov %s908_s29  ;;  %s1143_s29 = smov %s998_s14 }
 0x271   : > { %s1144_s30 = smov %s987_s11  ;;  %24 = sbr.rel (!%p22_p5) target bundleno = 8 (0x8), region = 100 }
 0x276   :  { %612 = vsyncpa [#allocation3], 1 }
 0x277   :  { %614 = vsyncpa [#allocation3 + $0x1], 1 }
 0x278   :  { %615 = vsyncpa [#allocation5], 1 }
 0x279   :  { %617 = vsyncpa [#allocation5 + $0x1], 1 }

</bundles_post_ra>
